<compile_context>
chip_gen: v5e
topology: v5e:2x2
jax: 0.10.0
libtpu: 0.0.40
codegen_flags: <defaults>
</compile_context>

<pallas_src>
from functools import partial

import jax
import jax.numpy as jnp
from jax.experimental import pallas as pl
from jax.experimental.pallas import tpu as pltpu

EPS = 1e-5  # nn.BatchNorm2d default


# --------------------------------------------------------------------------
# Hardware-aware sizing helpers
# --------------------------------------------------------------------------
def _vmem_budget():
    """~75% of physical VMEM (v5e/v6e: 96 MiB, v7x: 48 MiB); safe fallback."""
    cap = 64 << 20  # conservative default (v7x physical)
    try:
        cap = int(pltpu.get_tpu_info().vmem_capacity_bytes)
    except Exception:
        pass
    return int(cap * 3 // 4)


def _apply_compute_dtype(x_dtype):
    """bf16 apply math on chips with a bf16 VPU; f32 otherwise."""
    if x_dtype == jnp.bfloat16:
        try:
            kind = jax.devices()[0].device_kind.lower()
            if "v5" in kind:          # v5e has no bf16 VALU -> keep f32
                return jnp.float32
        except Exception:
            pass
        return jnp.bfloat16
    return jnp.float32


def _plan_tiles(N, C, M, itemsize, budget):
    """Choose (Nb, tile_m) so a (Nb, C, tile_m) block is ~target bytes.

    tile_m is a multiple of 128 (<= M) or the full extent M (when M < 128).
    Nb divides N.  Constraint kept: 4*block + 2*f32 stats scratch << budget.
    """
    slack = 4 << 20
    target = min(8 << 20, max(1 << 20, (budget - slack) // 8))

    if M < 128:
        tile_m = M                                  # full-extent lane block
    else:
        tile_m = (M // 128) * 128                   # largest 128-multiple <= M
        cap = max(128, (target // max(1, N * C * itemsize)) // 128 * 128)
        tile_m = min(tile_m, cap)
        if M % 128 == 0:                            # prefer an exact divisor
            t = tile_m
            while t > 128 and M % t != 0:
                t -= 128
            if M % t == 0:
                tile_m = t

    col_bytes = C * tile_m * itemsize               # bytes per batch element
    nb_cap = max(1, target // max(1, col_bytes))
    Nb = N
    if Nb > nb_cap:
        Nb = int(nb_cap)
        while N % Nb != 0:                          # largest divisor of N
            Nb -= 1
    return Nb, tile_m


# --------------------------------------------------------------------------
# Kernels
# --------------------------------------------------------------------------
def _bn_fused_kernel(x_ref, g_ref, b_ref, o_ref, *, inv_count, eps):
    """Single pass: stats + normalize with the whole tensor resident in VMEM."""
    xs = x_ref[...].astype(jnp.float32)                       # (N, C, M)
    s = jnp.sum(xs, axis=(0, 2), keepdims=True)               # (1, C, 1)
    s2 = jnp.sum(xs * xs, axis=(0, 2), keepdims=True)
    mean = s * inv_count
    var = s2 * inv_count - mean * mean                        # biased var, f32
    inv = jax.lax.rsqrt(var + eps)
    a = g_ref[...][None] * inv                                # (1, C, 1)
    b = b_ref[...][None] - mean * a
    o_ref[...] = (xs * a + b).astype(o_ref.dtype)


def _bn_stats_kernel(x_ref, psum_ref, psq_ref, acc_sum, acc_sq, *,
                     tiles_per_slice, tile_m, m_total, ragged):
    """Accumulate per-channel sum / sum-of-squares over one (batch-block, slice).

    Elementwise VALU accumulation into (C, tile_m) f32 scratch; one cross-lane
    reduce at the last step emits this slice's partial (sum, sumsq) column.
    """
    t = pl.program_id(2)

    @pl.when(t == 0)
    def _():
        acc_sum[...] = jnp.zeros_like(acc_sum)
        acc_sq[...] = jnp.zeros_like(acc_sq)

    xs = x_ref[...].astype(jnp.float32)                       # (Nb, C, tile_m)
    if ragged:
        g = pl.program_id(1) * tiles_per_slice + t            # global m-tile
        off = g * tile_m + jax.lax.broadcasted_iota(
            jnp.int32, (1, 1, tile_m), 2)
        xs = jnp.where(off < m_total, xs, 0.0)                # mask tail lanes

    acc_sum[...] += jnp.sum(xs, axis=0)                       # (C, tile_m)
    acc_sq[...] += jnp.sum(xs * xs, axis=0)

    @pl.when(t == pl.num_programs(2) - 1)
    def _():
        psum_ref[...] = jnp.sum(acc_sum[...], axis=1, keepdims=True)[None]
        psq_ref[...] = jnp.sum(acc_sq[...], axis=1, keepdims=True)[None]


def _bn_apply_kernel(x_ref, a_ref, b_ref, o_ref):
    """y = x * scale + shift (per channel) — one multiply-add per element."""
    a = a_ref[...][None, :, :]                                # (1, C, 1)
    b = b_ref[...][None, :, :]
    x = x_ref[...].astype(a.dtype)                            # no-op when dtypes match
    o_ref[...] = (x * a + b).astype(o_ref.dtype)


# --------------------------------------------------------------------------
# Single-branch BatchNorm2d (training-mode)
# --------------------------------------------------------------------------
def _batchnorm2d_single(x_nchw, gamma, beta, eps=EPS, force_two_pass=False):
    N, C, H, W = x_nchw.shape
    M = H * W
    itemsize = jnp.dtype(x_nchw.dtype).itemsize
    budget = _vmem_budget()

    x = x_nchw.reshape(N, C, M)                   # free, contiguous reshape
    g = gamma.reshape(C, 1).astype(jnp.float32)
    b = beta.reshape(C, 1).astype(jnp.float32)
    inv_count = 1.0 / (N * M)

    # ---------------- Fused single-pass path (whole tensor in VMEM) --------
    x_f32_bytes = N * C * M * 4
    if (not force_two_pass) and (8 * x_f32_bytes + (2 << 20) <= budget):
        full_spec = pl.BlockSpec((N, C, M), lambda i: (0, 0, 0))
        vec_spec = pl.BlockSpec((C, 1), lambda i: (0, 0))
        out = pl.pallas_call(
            partial(_bn_fused_kernel, inv_count=inv_count, eps=eps),
            out_shape=jax.ShapeDtypeStruct((N, C, M), x.dtype),
            grid_spec=pltpu.PrefetchScalarGridSpec(
                num_scalar_prefetch=0,
                grid=(1,),
                in_specs=[full_spec, vec_spec, vec_spec],
                out_specs=full_spec),
            compiler_params=pltpu.CompilerParams(
                dimension_semantics=("arbitrary",),
                vmem_limit_bytes=budget),
        )(x, g, b)
        return out.reshape(N, C, H, W)

    # ---------------- Streaming two-pass path -------------------------------
    Nb, tile_m = _plan_tiles(N, C, M, itemsize, budget)
    n_blocks = N // Nb
    m_tiles = pl.cdiv(M, tile_m)
    ragged = (M % tile_m) != 0
    # If there is only one batch block, split the m-tile range in two so the
    # stats pass still has a "parallel" axis (v7x megacore) when it divides.
    n_slices = 2 if (n_blocks == 1 and m_tiles % 2 == 0 and m_tiles >= 4) else 1
    tiles_per_slice = m_tiles // n_slices
    p_total = n_blocks * n_slices

    # Pass 1: partial per-channel sums / sums-of-squares.
    x_stats_spec = pl.BlockSpec(
        (Nb, C, tile_m), lambda nb, s, t: (nb, 0, s * tiles_per_slice + t))
    part_spec = pl.BlockSpec(
        (1, C, 1), lambda nb, s, t: (nb * n_slices + s, 0, 0))
    psum, psq = pl.pallas_call(
        partial(_bn_stats_kernel, tiles_per_slice=tiles_per_slice,
                tile_m=tile_m, m_total=M, ragged=ragged),
        out_shape=(jax.ShapeDtypeStruct((p_total, C, 1), jnp.float32),
                   jax.ShapeDtypeStruct((p_total, C, 1), jnp.float32)),
        grid_spec=pltpu.PrefetchScalarGridSpec(
            num_scalar_prefetch=0,
            grid=(n_blocks, n_slices, tiles_per_slice),
            in_specs=[x_stats_spec],
            out_specs=(part_spec, part_spec),
            scratch_shapes=[pltpu.VMEM((C, tile_m), jnp.float32),
                            pltpu.VMEM((C, tile_m), jnp.float32)]),
        compiler_params=pltpu.CompilerParams(
            dimension_semantics=("parallel", "parallel", "arbitrary"),
            vmem_limit_bytes=budget),
    )(x)

    # Tiny (C,1) fold in the wrapper: mean/var + gamma/beta -> scale/shift.
    s = jnp.sum(psum, axis=0)                     # (C, 1), f32
    s2 = jnp.sum(psq, axis=0)
    mean = s * inv_count
    var = s2 * inv_count - mean * mean
    inv = jax.lax.rsqrt(var + eps)
    scale = g * inv
    shift = b - mean * scale
    cdt = _apply_compute_dtype(x.dtype)
    scale = scale.astype(cdt)
    shift = shift.astype(cdt)

    # Pass 2: y = x * scale + shift, lane-dense streamed output.
    x_spec = pl.BlockSpec((Nb, C, tile_m), lambda nb, mt: (nb, 0, mt))
    vec_spec = pl.BlockSpec((C, 1), lambda nb, mt: (0, 0))
    out = pl.pallas_call(
        _bn_apply_kernel,
        out_shape=jax.ShapeDtypeStruct((N, C, M), x.dtype),
        grid_spec=pltpu.PrefetchScalarGridSpec(
            num_scalar_prefetch=0,
            grid=(n_blocks, m_tiles),
            in_specs=[x_spec, vec_spec, vec_spec],
            out_specs=x_spec),
        compiler_params=pltpu.CompilerParams(
            dimension_semantics=("parallel", "parallel"),
            vmem_limit_bytes=budget),
    )(x, scale, shift)

    return out.reshape(N, C, H, W)                # free reshape back to NCHW


def batchnorm2d_parallel(x_parallel, gammas, betas):
    """Mirror of BatchNorm2dParallel.forward: one independent BN per branch."""
    # Each branch has independent statistics/params; stacking branches into a
    # single call would require an HBM copy of every input (jnp.stack) that
    # this bandwidth-bound op cannot afford unless upstream already provides a
    # stacked layout.
    return [_batchnorm2d_single(x, gammas[i], betas[i])
            for i, x in enumerate(x_parallel)]


# --------------------------------------------------------------------------
# Reference + self-test
# --------------------------------------------------------------------------
def _reference_bn(x, gamma, beta):
    mean = jnp.mean(x, axis=(0, 2, 3), keepdims=True)
    var = jnp.mean((x - mean) ** 2, axis=(0, 2, 3), keepdims=True)
    return (x - mean) * jax.lax.rsqrt(var + EPS) * gamma.reshape(1, -1, 1, 1) \
        + beta.reshape(1, -1, 1, 1)


if __name__ == "__main__":
    num_parallel = 2
    N, C, H, W = 2, 4, 16, 16

    key = jax.random.PRNGKey(0)
    keys = jax.random.split(key, num_parallel)
    x_parallel = [
        jax.random.normal(keys[i], (N, C, H, W), dtype=jnp.float32)
        for i in range(num_parallel)
    ]

    # nn.BatchNorm2d.__init__: weight (gamma) = ones(C), bias (beta) = zeros(C)
    gammas = [jnp.ones((C,), jnp.float32) for _ in range(num_parallel)]
    betas = [jnp.zeros((C,), jnp.float32) for _ in range(num_parallel)]

    # Default dispatch (small shapes -> fused single-pass kernel).
    outs = batchnorm2d_parallel(x_parallel, gammas, betas)
    outs = [jax.block_until_ready(o) for o in outs]
    for i in range(num_parallel):
        ref = _reference_bn(x_parallel[i], gammas[i], betas[i])
        assert jnp.allclose(outs[i], ref, atol=1e-4, rtol=1e-4), \
            f"mismatch (fused) branch {i}"

    # Also exercise the streaming two-pass path on the same data.
    out_tp = _batchnorm2d_single(x_parallel[0], gammas[0], betas[0],
                                 force_two_pass=True)
    out_tp = jax.block_until_ready(out_tp)
    ref0 = _reference_bn(x_parallel[0], gammas[0], betas[0])
    assert jnp.allclose(out_tp, ref0, atol=1e-4, rtol=1e-4), \
        "mismatch (two-pass) branch 0"

    print("KERNEL_OK")
</pallas_src>

<mosaic_0001>
module attributes {stable_mosaic.version = 11 : i64} {
  func.func @_bn_fused_kernel(%arg0: i32, %arg1: memref<2x4x256xf32, #tpu.memory_space<vmem>>, %arg2: memref<4x1xf32, #tpu.memory_space<vmem>>, %arg3: memref<4x1xf32, #tpu.memory_space<vmem>>, %arg4: memref<2x4x256xf32, #tpu.memory_space<vmem>>) attributes {dimension_semantics = [#tpu.dimension_semantics<arbitrary>], iteration_bounds = array<i64: 1>, scalar_prefetch = 0 : i64, scratch_operands = 0 : i64, tpu.core_type = #tpu.core_type<tc>, window_params = [{pipeline_mode = #tpu.pipeline_mode<synchronous>, transform_indices = @transform_0, window_bounds = array<i64: 2, 4, 256>}, {pipeline_mode = #tpu.pipeline_mode<synchronous>, transform_indices = @transform_1, window_bounds = array<i64: 4, 1>}, {pipeline_mode = #tpu.pipeline_mode<synchronous>, transform_indices = @transform_2, window_bounds = array<i64: 4, 1>}, {pipeline_mode = #tpu.pipeline_mode<synchronous>, transform_indices = @transform_3, window_bounds = array<i64: 2, 4, 256>}]} {
    %c0 = arith.constant 0 : index
    %c0_0 = arith.constant 0 : index
    %c0_1 = arith.constant 0 : index
    %0 = vector.load %arg1[%c0, %c0_0, %c0_1] : memref<2x4x256xf32, #tpu.memory_space<vmem>>, vector<2x4x256xf32>
    %cst = arith.constant dense<0.000000e+00> : vector<4xf32>
    %1 = vector.multi_reduction <add>, %0, %cst [0, 2] : vector<2x4x256xf32> to vector<4xf32>
    %2 = vector.shape_cast %1 : vector<4xf32> to vector<1x4x1xf32>
    %3 = arith.mulf %0, %0 : vector<2x4x256xf32>
    %cst_2 = arith.constant dense<0.000000e+00> : vector<4xf32>
    %4 = vector.multi_reduction <add>, %3, %cst_2 [0, 2] : vector<2x4x256xf32> to vector<4xf32>
    %5 = vector.shape_cast %4 : vector<4xf32> to vector<1x4x1xf32>
    %cst_3 = arith.constant 0.001953125 : f32
    %6 = vector.broadcast %cst_3 : f32 to vector<1x4x1xf32>
    %7 = arith.mulf %2, %6 : vector<1x4x1xf32>
    %cst_4 = arith.constant 0.001953125 : f32
    %8 = vector.broadcast %cst_4 : f32 to vector<1x4x1xf32>
    %9 = arith.mulf %5, %8 : vector<1x4x1xf32>
    %10 = arith.mulf %7, %7 : vector<1x4x1xf32>
    %11 = arith.subf %9, %10 : vector<1x4x1xf32>
    %cst_5 = arith.constant 9.99999974E-6 : f32
    %12 = vector.broadcast %cst_5 : f32 to vector<1x4x1xf32>
    %13 = arith.addf %11, %12 : vector<1x4x1xf32>
    %14 = math.rsqrt %13 : vector<1x4x1xf32>
    %c0_6 = arith.constant 0 : index
    %c0_7 = arith.constant 0 : index
    %15 = vector.load %arg2[%c0_6, %c0_7] : memref<4x1xf32, #tpu.memory_space<vmem>>, vector<4x1xf32>
    %16 = vector.shape_cast %15 : vector<4x1xf32> to vector<1x4x1xf32>
    %17 = arith.mulf %16, %14 : vector<1x4x1xf32>
    %c0_8 = arith.constant 0 : index
    %c0_9 = arith.constant 0 : index
    %18 = vector.load %arg3[%c0_8, %c0_9] : memref<4x1xf32, #tpu.memory_space<vmem>>, vector<4x1xf32>
    %19 = vector.shape_cast %18 : vector<4x1xf32> to vector<1x4x1xf32>
    %20 = arith.mulf %7, %17 : vector<1x4x1xf32>
    %21 = arith.subf %19, %20 : vector<1x4x1xf32>
    %22 = vector.broadcast %17 : vector<1x4x1xf32> to vector<2x4x256xf32>
    %23 = arith.mulf %0, %22 : vector<2x4x256xf32>
    %24 = vector.broadcast %21 : vector<1x4x1xf32> to vector<2x4x256xf32>
    %25 = arith.addf %23, %24 : vector<2x4x256xf32>
    %c0_10 = arith.constant 0 : index
    %c0_11 = arith.constant 0 : index
    %c0_12 = arith.constant 0 : index
    %26 = vector.load %arg4[%c0_10, %c0_11, %c0_12] : memref<2x4x256xf32, #tpu.memory_space<vmem>>, vector<2x4x256xf32>
    tpu.vector_store %arg4[%c0_10, %c0_11, %c0_12], %25 {strides = array<i32>} : memref<2x4x256xf32, #tpu.memory_space<vmem>>, vector<2x4x256xf32>,
    return
  }
  func.func @transform_0(%arg0: i32) -> (i32, i32, i32) {
    %c0_i32 = arith.constant 0 : i32
    %c0_i32_0 = arith.constant 0 : i32
    %c0_i32_1 = arith.constant 0 : i32
    %c0_i32_2 = arith.constant 0 : i32
    return %c0_i32, %c0_i32_0, %c0_i32_1 : i32, i32, i32
  }
  func.func @transform_1(%arg0: i32) -> (i32, i32) {
    %c0_i32 = arith.constant 0 : i32
    %c0_i32_0 = arith.constant 0 : i32
    %c0_i32_1 = arith.constant 0 : i32
    return %c0_i32, %c0_i32_0 : i32, i32
  }
  func.func @transform_2(%arg0: i32) -> (i32, i32) {
    %c0_i32 = arith.constant 0 : i32
    %c0_i32_0 = arith.constant 0 : i32
    %c0_i32_1 = arith.constant 0 : i32
    return %c0_i32, %c0_i32_0 : i32, i32
  }
  func.func @transform_3(%arg0: i32) -> (i32, i32, i32) {
    %c0_i32 = arith.constant 0 : i32
    %c0_i32_0 = arith.constant 0 : i32
    %c0_i32_1 = arith.constant 0 : i32
    %c0_i32_2 = arith.constant 0 : i32
    return %c0_i32, %c0_i32_0, %c0_i32_1 : i32, i32, i32
  }
}

</mosaic_0001>

<bundles_post_ra>
// kernel: tpu_custom_call.1
= control target key start
LH: loop header
LB: loop body
LE: loop exit
PB: predicated region body
PF: predicated region fallthrough
CT: control target
= control target key end

     0   :  { %8 = vsyncpa [#allocation3], 0  ;;  %s269_s0 = inlined_call_operand.hbm [shape: f32[2,4,256], index: 0, kind: input, shape index: {}]   ;;  %s270_s1 = inlined_call_operand.vmem [shape: f32[4,1], index: 1, kind: input, shape index: {}]   ;;  %s271_s2 = inlined_call_operand.vmem [shape: f32[4,1], index: 2, kind: input, shape index: {}]   ;;  %s272_s3 = inlined_call_operand.hbm [shape: f32[2,4,256], index: 3, kind: output, shape index: {}]  }
   0x1   :  { %9 = vsyncpa [#allocation4], 0  ;;  %s14_s14 = sshll.u32 %s269_s0, 4  ;;  %s205_s15 = smov [#allocation2]   ;;  %s15_s14 = int_to_ptr.hbm [resolvable:$true] %s14_s14 }
   0x2   :  { %s16_s16 = sshll.u32 %s205_s15, 4  ;;  %s206_s17 = smov 128   ;;  %s17_s16 = int_to_ptr.vmem [resolvable:$true] %s16_s16 }
   0x3   :  { %s207_s18 = smov 8  }
   0x4   :  { %22 = dma.hbm_to_vmem [thread:$0]  %s15_s14, 256, %s17_s16, [#allocation3], %s206_s17, %s206_s17, %s207_s18  }
   0x5   :  { %201 = dma.done.wait [#allocation3], 256  }
   0x6   :  { %202 = vsyncadd [#allocation3], 4294967040  ;;  %v237_v0 = vld [vmem:[#allocation2] sm:$0xff]  ;;  %v239_v1 = vld [vmem:[#allocation2 + $0x8] sm:$0xff]  ;;  %vm46_vm0 = vcmask 1043456   ;;  %v208_v26 = vmov 0  }
   0x7   :  { %35 = vst [vmem:[#allocation1] ss:$2 sm:$0xff] %v237_v0  ;;  %v56_v2 = vmul.f32 %v237_v0, %v237_v0  ;;  %v57_v3 = vmul.f32 %v239_v1, %v239_v1  ;;  %149 = vset.pattern.permute.xlu1 %v208_v26  ;;  %150 = vset.pattern.permute.xlu0 %v208_v26  ;;  %v95_v40 = vld [vmem:[%s270_s1] sm:$0xf]  ;;  %v209_v46 = vmov 839922192  }
   0x8   :  { %39 = vst [vmem:[#allocation1 + $0x10] ss:$2 sm:$0xff] %v239_v1  ;;  %v97_v44 = vld [vmem:[%s271_s2] sm:$0xf]  ;;  %v105_v47 = vunpack.c.l.s4 %v209_v46  ;;  %s210_s1 = smov [#allocation5]   ;;  %s130_s25 = sshll.u32 %s272_s3, 4  ;;  %s131_s25 = int_to_ptr.hbm [resolvable:$true] %s130_s25 }
   0x9   :  { %s128_s22 = sshll.u32 %s210_s1, 4  ;;  %s129_s22 = int_to_ptr.vmem [resolvable:$true] %s128_s22 }
   0xa   :  { %v106_v49 = vunpack.c.0.s8 %v105_v47 }
   0xe   :  { %v36_v4 = vld.sshfl [vmem:[#allocation1] sm:$0xff pattern:$0x75316420]  ;;  %v37_v5 = vld.sshfl [vmem:[#allocation1 + $0x8] sm:$0xff pattern:$0x75316420] }
   0xf   :  { %v40_v6 = vld.sshfl [vmem:[#allocation1 + $0x10] sm:$0xff pattern:$0x75316420]  ;;  %v41_v7 = vld.sshfl [vmem:[#allocation1 + $0x18] sm:$0xff pattern:$0x75316420] }
  0x10   :  { %v47_v8 = vsel %vm46_vm0, %v36_v4, 0.0  ;;  %v48_v9 = vsel %vm46_vm0, %v37_v5, 0.0  ;;  %v50_v10 = vsel %vm46_vm0, %v40_v6, 0.0  ;;  %60 = vst [vmem:[#allocation1] ss:$2 sm:$0xff] %v56_v2  ;;  %v52_v12 = vsel %vm46_vm0, %v41_v7, 0.0 }
  0x11   :  { %v49_v11 = vadd.f32 %v48_v9, %v47_v8  ;;  %64 = vst [vmem:[#allocation1 + $0x10] ss:$2 sm:$0xff] %v57_v3 }
  0x13   :  { %v51_v13 = vadd.f32 %v50_v10, %v49_v11 }
  0x15   :  { %v53_v14 = vadd.f32 %v52_v12, %v51_v13 }
  0x17   :  { %54 = vadd.xlane.f32.xlu0 %v53_v14  ;;  %v61_v15 = vld.sshfl [vmem:[#allocation1] sm:$0xff pattern:$0x75316420]  ;;  %v62_v16 = vld.sshfl [vmem:[#allocation1 + $0x8] sm:$0xff pattern:$0x75316420] }
  0x18   :  { %v65_v17 = vld.sshfl [vmem:[#allocation1 + $0x10] sm:$0xff pattern:$0x75316420]  ;;  %v66_v18 = vld.sshfl [vmem:[#allocation1 + $0x18] sm:$0xff pattern:$0x75316420] }
  0x19   :  { %v71_v19 = vsel %vm46_vm0, %v61_v15, 0.0  ;;  %v72_v20 = vsel %vm46_vm0, %v62_v16, 0.0  ;;  %v74_v21 = vsel %vm46_vm0, %v65_v17, 0.0  ;;  %v76_v23 = vsel %vm46_vm0, %v66_v18, 0.0 }
  0x1a   :  { %v73_v22 = vadd.f32 %v72_v20, %v71_v19 }
  0x1c   :  { %v75_v24 = vadd.f32 %v74_v21, %v73_v22 }
  0x1e   :  { %v77_v25 = vadd.f32 %v76_v23, %v75_v24 }
  0x20   :  { %78 = vadd.xlane.f32.xlu0 %v77_v25 }
  0x8a   :  { %v55_v27 = vpop.xlane.xlu0 %54 }
  0x8b   :  { %v80_v28 = vmul.f32 0.001953125, %v55_v27 }
  0x8d   :  { %v82_v30 = vmul.f32 %v80_v28, %v80_v28 }
  0x93   :  { %v79_v29 = vpop.xlane.xlu0 %78 }
  0x94   :  { %v81_v31 = vmul.f32 0.001953125, %v79_v29 }
  0x96   :  { %v83_v32 = vsub.f32 %v81_v31, %v82_v30 }
  0x98   :  { %v84_v33 = vadd.f32 1e-05, %v83_v32 }
  0x9a   :  { %151 = vrsqrt.f32 %v84_v33  ;;  %vm91_vm2 = vweird.f32 %v84_v33 }
  0xa0   :  { %v152_v34 = vpop.eup %151 }
  0xa1   :  { %v86_v35 = vmul.f32 %v152_v34, %v84_v33  ;;  %vm92_vm1 = vweird.f32 %v152_v34 }
  0xa2   :  { %vm93_vm3 = vmor %vm91_vm2, %vm92_vm1 }
  0xa3   :  { %v87_v36 = vmul.f32 %v152_v34, %v86_v35 }
  0xa5   :  { %v88_v37 = vmul.f32 0.5, %v87_v36 }
  0xa7   :  { %v89_v38 = vsub.f32 1.5, %v88_v37 }
  0xa9   :  { %v90_v39 = vmul.f32 %v152_v34, %v89_v38 }
  0xab   :  { %v94_v41 = vsel %vm93_vm3, %v152_v34, %v90_v39 }
  0xac   :  { %v96_v42 = vmul.f32 %v95_v40, %v94_v41 }
  0xae   :  { %102 = vperm.xlu1 %149, %v96_v42   ;;  %v98_v43 = vmul.f32 %v96_v42, %v80_v28 }
  0xb0   :  { %v99_v45 = vsub.f32 %v97_v44, %v98_v43 }
  0xb6   :  { %113 = vperm.xlu1 %149, %v99_v45  }
 0x120   :  { %v103_v48 = vpop.permute.xlu1 %102 }
 0x121   :  { %v107_v50 = vperm.slane %v103_v48, %v106_v49 }
 0x123   :  { %v109_v52 = vmul.f32 %v107_v50, %v237_v0  ;;  %v110_v53 = vmul.f32 %v107_v50, %v239_v1 }
 0x128   :  { %v114_v51 = vpop.permute.xlu1 %113 }
 0x129   :  { %v118_v54 = vperm.slane %v114_v51, %v106_v49 }
 0x12b   :  { %v120_v55 = vadd.f32 %v118_v54, %v109_v52  ;;  %v121_v56 = vadd.f32 %v118_v54, %v110_v53 }
 0x12d   :  { %122 = vst [vmem:[#allocation5] sm:$0xff] %v120_v55 }
 0x12e   :  { %123 = vst [vmem:[#allocation5 + $0x8] sm:$0xff] %v121_v56 }
 0x12f   :  { %136 = dma.vmem_to_hbm [thread:$0]  %s129_s22, 256, %s131_s25, [#allocation4], %s206_s17, %s206_s17, %s207_s18  }
 0x130   :  { %203 = dma.done.wait [#allocation4], 256  }
 0x131   :  { %204 = vsyncadd [#allocation4], 4294967040 }
 0x132   :  { %141 = vsyncpa [#allocation3], 1 }
 0x133   :  { %142 = vsyncpa [#allocation4], 1 }

</bundles_post_ra>
